<compile_context>
chip_gen: v5e
topology: v5e:2x2
jax: 0.10.0
libtpu: 0.0.40
codegen_flags: <defaults>
</compile_context>

<pallas_src>
import functools

import jax
import jax.numpy as jnp
from jax.experimental import pallas as pl
from jax.experimental.pallas import tpu as pltpu


def _fused_residual_block_kernel(ph_ref, mask_ref, w1s_ref, bcomb_ref, w2_ref,
                                 out_ref, *, c2, wp2):
    """One grid step == `nb` images packed on the lane axis (L = nb*128 lanes).

    ph_ref:    (4*Cin, L)  phase-split input: row (phi*Cin + c), phi = 2*pr+pc,
                           holds x[c, 2r+pr, 2s+pc] at padded-flat lane
                           (r+1)*wp2 + (s+1) of its image's 128-lane chunk;
                           ring + tail lanes are zero.
    mask_ref:  (1, L)      1.0 at valid interior output lanes, 0 elsewhere.
    w1s_ref:   (4, 2*C2, 4*Cin) conv1 (+ identity) weights grouped by the lane
                           shift of the tap they multiply (shift order
                           0, 1, wp2, wp2+1).  Rows [C2:] of group 0 hold the
                           1x1-s2 identity weights (centre tap == EE, shift 0).
    bcomb_ref: (2*C2, 1)   [b1 ; b_id + b2]  (b2 folded into the residual rows).
    w2_ref:    (C2, 9*C2)  conv2 weights, column index = (kh*3+kw)*C2 + cin.
    out_ref:   (C2, L)     fused output on the padded grid (ring/tail lanes are
                           garbage; cropped by the wrapper).
    """
    lanes = ph_ref.shape[-1]
    ph = ph_ref[...]
    mask = mask_ref[...]

    # ---- Stage 1: conv1(3x3, s2) + identity(1x1, s2).  Taps grouped by lane
    # shift -> 4 MXU matmuls (K = 4*Cin); operands are XLU lane-rolls of the
    # resident phase block, so no im2col is ever materialised.
    comb = jnp.dot(w1s_ref[0], ph, preferred_element_type=jnp.float32)
    for i, s in enumerate((1, wp2, wp2 + 1), start=1):
        comb = comb + jnp.dot(w1s_ref[i], pltpu.roll(ph, s, axis=1),
                              preferred_element_type=jnp.float32)
    comb = comb + bcomb_ref[...]

    y1 = jnp.maximum(comb[:c2, :], 0.0) * mask   # ReLU(layer1) + zero ring/tail
    res = comb[c2:, :]                           # identity(x) + b_id + b2

    # ---- Stage 2: conv2 (3x3, stride 1).  y1 stays in VMEM/vregs; its nine
    # taps are lane rolls (XLU slot) concatenated along the contraction axis
    # for a single K = 9*C2 MXU matmul.  Interior lanes never read across an
    # image's 128-lane chunk (|shift| <= wp2+1), and ring/tail lanes of y1 are
    # exact zeros, i.e. conv2's zero padding.
    taps2 = jnp.concatenate(
        [y1 if (kh == 1 and kw == 1)
         else pltpu.roll(y1, (-((kh - 1) * wp2 + (kw - 1))) % lanes, axis=1)
         for kh in range(3) for kw in range(3)],
        axis=0)                                  # (9*C2, L)
    out = jnp.dot(w2_ref[...], taps2, preferred_element_type=jnp.float32)
    out_ref[...] = jnp.maximum(out + res, 0.0)   # ReLU(residual + layer2)


def _phase_layout(x_nchw, lanes_img):
    """(N, Cin, H, W) -> (4*Cin, N*lanes_img) phase-split padded-flat layout."""
    n, cin, h, w = x_nchw.shape
    ho, wo = h // 2, w // 2
    hp2, wp2 = ho + 2, wo + 2
    lp = hp2 * wp2
    x6 = x_nchw.reshape(n, cin, ho, 2, wo, 2)               # (n,c,r,pr,s,pc)
    ph = jnp.transpose(x6, (0, 3, 5, 1, 2, 4))              # (n,pr,pc,c,r,s)
    ph = ph.reshape(n, 4 * cin, ho, wo)
    ph = jnp.pad(ph, ((0, 0), (0, 0), (1, 1), (1, 1)))      # zero ring
    ph = ph.reshape(n, 4 * cin, lp)
    ph = jnp.pad(ph, ((0, 0), (0, 0), (0, lanes_img - lp)))  # lane pad to 128k
    return jnp.transpose(ph, (1, 0, 2)).reshape(4 * cin, n * lanes_img)


def _prep_weights(params, cin, wp2):
    """Shift-grouped conv1/identity weights + folded biases + conv2 weights."""
    c2 = 2 * cin
    shift_order = (0, 1, wp2, wp2 + 1)
    w1s = jnp.zeros((4, 2 * c2, 4 * cin), jnp.float32)
    for kh in range(3):
        pr, dh = (0, 0) if kh == 1 else (1, -1 if kh == 0 else 0)
        for kw in range(3):
            pc, dw = (0, 0) if kw == 1 else (1, -1 if kw == 0 else 0)
            phi = 2 * pr + pc
            sidx = shift_order.index(-(dh * wp2 + dw))
            w1s = w1s.at[sidx, :c2, phi * cin:(phi + 1) * cin].set(
                params["w1"][:, :, kh, kw])
    # The 1x1 stride-2 identity conv reads exactly conv1's centre tap (EE phase,
    # shift 0), so it becomes extra output rows of the shift-0 matmul.
    w1s = w1s.at[0, c2:, 0:cin].set(params["w_id"][:, :, 0, 0])
    bcomb = jnp.concatenate(
        [params["b1"], params["b_id"] + params["b2"]]).reshape(2 * c2, 1)
    w2_t = jnp.transpose(params["w2"], (0, 2, 3, 1)).reshape(c2, 9 * c2)
    return w1s, bcomb, w2_t


@functools.partial(jax.jit, static_argnames=("images_per_step",))
def residual_block_forward(x_nchw, params, *, images_per_step=None):
    """Forward of residual_block(in_channels, downsample=True, normalization=None).

    x_nchw: (N, Cin, H, W) f32, H and W even -> (N, 2*Cin, H//2, W//2) f32.
    """
    n, cin, h, w = x_nchw.shape
    c2 = 2 * cin
    ho, wo = h // 2, w // 2
    hp2, wp2 = ho + 2, wo + 2
    lp = hp2 * wp2
    lanes_img = ((lp + 127) // 128) * 128        # lane-dense per-image chunk

    if images_per_step is None:
        images_per_step = max(1, min(8, n // 2))  # keep >= 2 grid steps (v7x)
    nb = images_per_step
    n_pad = ((n + nb - 1) // nb) * nb
    xb = x_nchw if n_pad == n else jnp.pad(
        x_nchw, ((0, n_pad - n), (0, 0), (0, 0), (0, 0)))

    phases = _phase_layout(xb, lanes_img)         # (4*Cin, n_pad*lanes_img)
    w1s, bcomb, w2_t = _prep_weights(params, cin, wp2)

    mask = (jnp.zeros((hp2, wp2), jnp.float32)
            .at[1:1 + ho, 1:1 + wo].set(1.0).reshape(1, lp))
    mask = jnp.pad(mask, ((0, 0), (0, lanes_img - lp)))
    mask = jnp.tile(mask, (1, nb))                # (1, nb*lanes_img)

    blk = nb * lanes_img
    kernel = functools.partial(_fused_residual_block_kernel, c2=c2, wp2=wp2)

    out_flat = pl.pallas_call(
        kernel,
        grid=(n_pad // nb,),                      # pipelined over packed batch
        in_specs=[
            # per-step activation block (streamed / double-buffered, lane-dense)
            pl.BlockSpec((4 * cin, blk), lambda b: (0, b)),
            # constants: DMA'd once, stay resident across grid steps
            pl.BlockSpec((1, blk), lambda b: (0, 0)),
            pl.BlockSpec((4, 2 * c2, 4 * cin), lambda b: (0, 0, 0)),
            pl.BlockSpec((2 * c2, 1), lambda b: (0, 0)),
            pl.BlockSpec((c2, 9 * c2), lambda b: (0, 0)),
        ],
        out_specs=pl.BlockSpec((c2, blk), lambda b: (0, b)),
        out_shape=jax.ShapeDtypeStruct((c2, n_pad * lanes_img), jnp.float32),
        compiler_params=pltpu.CompilerParams(
            dimension_semantics=("parallel",),    # megacore / 2nd TC on v7x
            vmem_limit_bytes=32 * 1024 * 1024),   # v7x-safe headroom
    )(phases, mask, w1s, bcomb, w2_t)

    # Un-pack lanes -> NCHW and crop the padding ring / batch pad.
    out = out_flat.reshape(c2, n_pad, lanes_img).transpose(1, 0, 2)[:n, :, :lp]
    return out.reshape(n, c2, hp2, wp2)[:, :, 1:1 + ho, 1:1 + wo]


def _reference_forward(x, p):
    """Pure-JAX (XLA conv) replica of the PyTorch forward, for verification."""
    def conv(inp, wgt, b, stride, pad):
        y = jax.lax.conv_general_dilated(
            inp, wgt, window_strides=(stride, stride),
            padding=[(pad, pad), (pad, pad)],
            dimension_numbers=("NCHW", "OIHW", "NCHW"))
        return y + b[None, :, None, None]

    residual = conv(x, p["w_id"], p["b_id"], 2, 0)       # identity_downsample
    hid = jax.nn.relu(conv(x, p["w1"], p["b1"], 2, 1))   # ReLU(layer1(x))
    hid = conv(hid, p["w2"], p["b2"], 1, 1)              # layer2(...)
    return jax.nn.relu(residual + hid)


if __name__ == "__main__":
    in_channels = 4
    c2 = in_channels * 2
    key = jax.random.PRNGKey(0)
    kx, kid, k1, k2 = jax.random.split(key, 4)

    def conv_params(k, out_c, in_c, ksize):
        kw_, kb_ = jax.random.split(k)
        bound = (in_c * ksize * ksize) ** -0.5  # PyTorch-style uniform init
        wgt = jax.random.uniform(kw_, (out_c, in_c, ksize, ksize),
                                 jnp.float32, -bound, bound)
        b = jax.random.uniform(kb_, (out_c,), jnp.float32, -bound, bound)
        return wgt, b

    w_id, b_id = conv_params(kid, c2, in_channels, 1)
    w1, b1 = conv_params(k1, c2, in_channels, 3)
    w2, b2 = conv_params(k2, c2, c2, 3)
    params = dict(w_id=w_id, b_id=b_id, w1=w1, b1=b1, w2=w2, b2=b2)

    x = jax.random.normal(kx, (2, in_channels, 16, 16), jnp.float32)

    out = jax.block_until_ready(residual_block_forward(x, params))
    assert out.shape == (2, c2, 8, 8), out.shape

    ref = _reference_forward(x, params)
    max_err = float(jnp.max(jnp.abs(out - ref)))
    assert max_err < 1e-4, f"mismatch vs reference: max_err={max_err}"
    print("KERNEL_OK")
</pallas_src>

<mosaic_0001>
module attributes {stable_mosaic.version = 11 : i64} {
  func.func @_fused_residual_block_kernel(%arg0: i32, %arg1: memref<16x128xf32, #tpu.memory_space<vmem>>, %arg2: memref<1x128xf32, #tpu.memory_space<vmem>>, %arg3: memref<4x16x16xf32, #tpu.memory_space<vmem>>, %arg4: memref<16x1xf32, #tpu.memory_space<vmem>>, %arg5: memref<8x72xf32, #tpu.memory_space<vmem>>, %arg6: memref<8x128xf32, #tpu.memory_space<vmem>>) attributes {dimension_semantics = [#tpu.dimension_semantics<parallel>], iteration_bounds = array<i64: 2>, scalar_prefetch = 0 : i64, scratch_operands = 0 : i64, tpu.core_type = #tpu.core_type<tc>, window_params = [{transform_indices = @transform_0, window_bounds = array<i64: 16, 128>}, {pipeline_mode = #tpu.pipeline_mode<synchronous>, transform_indices = @transform_1, window_bounds = array<i64: 1, 128>}, {pipeline_mode = #tpu.pipeline_mode<synchronous>, transform_indices = @transform_2, window_bounds = array<i64: 4, 16, 16>}, {pipeline_mode = #tpu.pipeline_mode<synchronous>, transform_indices = @transform_3, window_bounds = array<i64: 16, 1>}, {pipeline_mode = #tpu.pipeline_mode<synchronous>, transform_indices = @transform_4, window_bounds = array<i64: 8, 72>}, {transform_indices = @transform_5, window_bounds = array<i64: 8, 128>}]} {
    %c0 = arith.constant 0 : index
    %c0_0 = arith.constant 0 : index
    %0 = vector.load %arg1[%c0, %c0_0] : memref<16x128xf32, #tpu.memory_space<vmem>>, vector<16x128xf32>
    %c0_1 = arith.constant 0 : index
    %c0_2 = arith.constant 0 : index
    %1 = vector.load %arg2[%c0_1, %c0_2] : memref<1x128xf32, #tpu.memory_space<vmem>>, vector<1x128xf32>
    %c0_3 = arith.constant 0 : index
    %c0_4 = arith.constant 0 : index
    %c0_5 = arith.constant 0 : index
    %2 = vector.load %arg3[%c0_3, %c0_4, %c0_5] : memref<4x16x16xf32, #tpu.memory_space<vmem>>, vector<1x16x16xf32>
    %3 = vector.shape_cast %2 : vector<1x16x16xf32> to vector<16x16xf32>
    %cst = arith.constant dense<0.000000e+00> : vector<16x128xf32>
    %4 = tpu.matmul %3, %0, %cst {dimension_numbers = #tpu.dot_dimension_numbers<[1], [0], [0], [1], [0, 0, 1, 1], [], []>} : vector<16x16xf32>, vector<16x128xf32>, vector<16x128xf32> -> vector<16x128xf32>
    %c1 = arith.constant 1 : index
    %c0_6 = arith.constant 0 : index
    %c0_7 = arith.constant 0 : index
    %5 = vector.load %arg3[%c1, %c0_6, %c0_7] : memref<4x16x16xf32, #tpu.memory_space<vmem>>, vector<1x16x16xf32>
    %6 = vector.shape_cast %5 : vector<1x16x16xf32> to vector<16x16xf32>
    %c1_i32 = arith.constant 1 : i32
    %7 = tpu.dynamic_rotate %0 by %c1_i32 dim 1 : vector<16x128xf32>, i32 -> vector<16x128xf32>
    %cst_8 = arith.constant dense<0.000000e+00> : vector<16x128xf32>
    %8 = tpu.matmul %6, %7, %cst_8 {dimension_numbers = #tpu.dot_dimension_numbers<[1], [0], [0], [1], [0, 0, 1, 1], [], []>} : vector<16x16xf32>, vector<16x128xf32>, vector<16x128xf32> -> vector<16x128xf32>
    %9 = arith.addf %4, %8 : vector<16x128xf32>
    %c2 = arith.constant 2 : index
    %c0_9 = arith.constant 0 : index
    %c0_10 = arith.constant 0 : index
    %10 = vector.load %arg3[%c2, %c0_9, %c0_10] : memref<4x16x16xf32, #tpu.memory_space<vmem>>, vector<1x16x16xf32>
    %11 = vector.shape_cast %10 : vector<1x16x16xf32> to vector<16x16xf32>
    %c10_i32 = arith.constant 10 : i32
    %12 = tpu.dynamic_rotate %0 by %c10_i32 dim 1 : vector<16x128xf32>, i32 -> vector<16x128xf32>
    %cst_11 = arith.constant dense<0.000000e+00> : vector<16x128xf32>
    %13 = tpu.matmul %11, %12, %cst_11 {dimension_numbers = #tpu.dot_dimension_numbers<[1], [0], [0], [1], [0, 0, 1, 1], [], []>} : vector<16x16xf32>, vector<16x128xf32>, vector<16x128xf32> -> vector<16x128xf32>
    %14 = arith.addf %9, %13 : vector<16x128xf32>
    %c3 = arith.constant 3 : index
    %c0_12 = arith.constant 0 : index
    %c0_13 = arith.constant 0 : index
    %15 = vector.load %arg3[%c3, %c0_12, %c0_13] : memref<4x16x16xf32, #tpu.memory_space<vmem>>, vector<1x16x16xf32>
    %16 = vector.shape_cast %15 : vector<1x16x16xf32> to vector<16x16xf32>
    %c11_i32 = arith.constant 11 : i32
    %17 = tpu.dynamic_rotate %0 by %c11_i32 dim 1 : vector<16x128xf32>, i32 -> vector<16x128xf32>
    %cst_14 = arith.constant dense<0.000000e+00> : vector<16x128xf32>
    %18 = tpu.matmul %16, %17, %cst_14 {dimension_numbers = #tpu.dot_dimension_numbers<[1], [0], [0], [1], [0, 0, 1, 1], [], []>} : vector<16x16xf32>, vector<16x128xf32>, vector<16x128xf32> -> vector<16x128xf32>
    %19 = arith.addf %14, %18 : vector<16x128xf32>
    %c0_15 = arith.constant 0 : index
    %c0_16 = arith.constant 0 : index
    %20 = vector.load %arg4[%c0_15, %c0_16] : memref<16x1xf32, #tpu.memory_space<vmem>>, vector<16x1xf32>
    %21 = vector.broadcast %20 : vector<16x1xf32> to vector<16x128xf32>
    %22 = arith.addf %19, %21 : vector<16x128xf32>
    %23 = vector.extract_strided_slice %22 {offsets = [0, 0], sizes = [8, 128], strides = [1, 1]} : vector<16x128xf32> to vector<8x128xf32>
    %cst_17 = arith.constant 0.000000e+00 : f32
    %24 = vector.broadcast %cst_17 : f32 to vector<8x128xf32>
    %25 = arith.maximumf %23, %24 : vector<8x128xf32>
    %26 = vector.broadcast %1 : vector<1x128xf32> to vector<8x128xf32>
    %27 = arith.mulf %25, %26 : vector<8x128xf32>
    %28 = vector.extract_strided_slice %22 {offsets = [8, 0], sizes = [8, 128], strides = [1, 1]} : vector<16x128xf32> to vector<8x128xf32>
    %c11_i32_18 = arith.constant 11 : i32
    %29 = tpu.dynamic_rotate %27 by %c11_i32_18 dim 1 : vector<8x128xf32>, i32 -> vector<8x128xf32>
    %c10_i32_19 = arith.constant 10 : i32
    %30 = tpu.dynamic_rotate %27 by %c10_i32_19 dim 1 : vector<8x128xf32>, i32 -> vector<8x128xf32>
    %c9_i32 = arith.constant 9 : i32
    %31 = tpu.dynamic_rotate %27 by %c9_i32 dim 1 : vector<8x128xf32>, i32 -> vector<8x128xf32>
    %c1_i32_20 = arith.constant 1 : i32
    %32 = tpu.dynamic_rotate %27 by %c1_i32_20 dim 1 : vector<8x128xf32>, i32 -> vector<8x128xf32>
    %c127_i32 = arith.constant 127 : i32
    %33 = tpu.dynamic_rotate %27 by %c127_i32 dim 1 : vector<8x128xf32>, i32 -> vector<8x128xf32>
    %c119_i32 = arith.constant 119 : i32
    %34 = tpu.dynamic_rotate %27 by %c119_i32 dim 1 : vector<8x128xf32>, i32 -> vector<8x128xf32>
    %c118_i32 = arith.constant 118 : i32
    %35 = tpu.dynamic_rotate %27 by %c118_i32 dim 1 : vector<8x128xf32>, i32 -> vector<8x128xf32>
    %c117_i32 = arith.constant 117 : i32
    %36 = tpu.dynamic_rotate %27 by %c117_i32 dim 1 : vector<8x128xf32>, i32 -> vector<8x128xf32>
    %37 = tpu.concatenate %29, %30, %31, %32, %27, %33, %34, %35, %36 in 0 : vector<8x128xf32>, vector<8x128xf32>, vector<8x128xf32>, vector<8x128xf32>, vector<8x128xf32>, vector<8x128xf32>, vector<8x128xf32>, vector<8x128xf32>, vector<8x128xf32> -> vector<72x128xf32>
    %c0_21 = arith.constant 0 : index
    %c0_22 = arith.constant 0 : index
    %38 = vector.load %arg5[%c0_21, %c0_22] : memref<8x72xf32, #tpu.memory_space<vmem>>, vector<8x72xf32>
    %cst_23 = arith.constant dense<0.000000e+00> : vector<8x128xf32>
    %39 = tpu.matmul %38, %37, %cst_23 {dimension_numbers = #tpu.dot_dimension_numbers<[1], [0], [0], [1], [0, 0, 1, 1], [], []>} : vector<8x72xf32>, vector<72x128xf32>, vector<8x128xf32> -> vector<8x128xf32>
    %40 = arith.addf %39, %28 : vector<8x128xf32>
    %cst_24 = arith.constant 0.000000e+00 : f32
    %41 = vector.broadcast %cst_24 : f32 to vector<8x128xf32>
    %42 = arith.maximumf %40, %41 : vector<8x128xf32>
    %c0_25 = arith.constant 0 : index
    %c0_26 = arith.constant 0 : index
    %43 = vector.load %arg6[%c0_25, %c0_26] : memref<8x128xf32, #tpu.memory_space<vmem>>, vector<8x128xf32>
    tpu.vector_store %arg6[%c0_25, %c0_26], %42 {strides = array<i32>} : memref<8x128xf32, #tpu.memory_space<vmem>>, vector<8x128xf32>,
    return
  }
  func.func @transform_0(%arg0: i32) -> (i32, i32) {
    %c0_i32 = arith.constant 0 : i32
    %c0_i32_0 = arith.constant 0 : i32
    return %c0_i32, %arg0 : i32, i32
  }
  func.func @transform_1(%arg0: i32) -> (i32, i32) {
    %c0_i32 = arith.constant 0 : i32
    %c0_i32_0 = arith.constant 0 : i32
    %c0_i32_1 = arith.constant 0 : i32
    return %c0_i32, %c0_i32_0 : i32, i32
  }
  func.func @transform_2(%arg0: i32) -> (i32, i32, i32) {
    %c0_i32 = arith.constant 0 : i32
    %c0_i32_0 = arith.constant 0 : i32
    %c0_i32_1 = arith.constant 0 : i32
    %c0_i32_2 = arith.constant 0 : i32
    return %c0_i32, %c0_i32_0, %c0_i32_1 : i32, i32, i32
  }
  func.func @transform_3(%arg0: i32) -> (i32, i32) {
    %c0_i32 = arith.constant 0 : i32
    %c0_i32_0 = arith.constant 0 : i32
    %c0_i32_1 = arith.constant 0 : i32
    return %c0_i32, %c0_i32_0 : i32, i32
  }
  func.func @transform_4(%arg0: i32) -> (i32, i32) {
    %c0_i32 = arith.constant 0 : i32
    %c0_i32_0 = arith.constant 0 : i32
    %c0_i32_1 = arith.constant 0 : i32
    return %c0_i32, %c0_i32_0 : i32, i32
  }
  func.func @transform_5(%arg0: i32) -> (i32, i32) {
    %c0_i32 = arith.constant 0 : i32
    %c0_i32_0 = arith.constant 0 : i32
    return %c0_i32, %arg0 : i32, i32
  }
}

</mosaic_0001>

<bundles_post_ra>
// kernel: residual_block_forward.1
= control target key start
LH: loop header
LB: loop body
LE: loop exit
PB: predicated region body
PF: predicated region fallthrough
CT: control target
= control target key end

     0   :  { %s670_s18 = smov 0   ;;  %s672_s19 = smov 0   ;;  %s774_s0 = inlined_call_operand.vmem [shape: f32[16,256], index: 0, kind: input, shape index: {}]   ;;  %s775_s1 = inlined_call_operand.vmem [shape: f32[1,128], index: 1, kind: input, shape index: {}]   ;;  %s776_s2 = inlined_call_operand.vmem [shape: f32[4,16,16], index: 2, kind: input, shape index: {}]   ;;  %s777_s3 = inlined_call_operand.vmem [shape: f32[16,1], index: 3, kind: input, shape index: {}]   ;;  %s778_s4 = inlined_call_operand.vmem [shape: f32[8,72], index: 4, kind: input, shape index: {}]   ;;  %s779_s5 = inlined_call_operand.vmem [shape: f32[8,256], index: 5, kind: output, shape index: {}]  }
   0x1   :  { %s674_s20 = smov 0  }
   0x2 LB: > { %s530_s21 = sadd.s32 4294967295, %s629_s20   ;;  %s687_s22 = sadd.s32 1, %s629_s20   ;;  %s629_s20 = sphi %s674_s20, %s782_s20   ;;  %s625_s19 = sphi %s672_s19, %s781_s19   ;;  %s621_s18 = sphi %s670_s18, %s780_s18  }
   0x3   : > { %s19_s23 = ssub.s32 %s629_s20, %s687_s22  ;;  %s22_s24 = sadd.s32 1, %s625_s19 }
   0x4   : > { %p20_p0 = scmp.eq.s32.totalorder %s19_s23, 0  ;;  %p29_p1 = scmp.ne.s32.totalorder %s625_s19, %s621_s18 }
   0x5   : > { %p30_p2 = scmp.eq.s32.totalorder %s629_s20, 0  ;;  %p533_p4 = scmp.ge.s32.totalorder %s629_s20, 2 }
   0x6   : > { %s696_s25 = scalar_select %p20_p0, %s625_s19, %s22_s24  }
   0x7   : > { %p31_p3 = por %p30_p2, %p29_p1  ;;  %177 = sbr.rel (%p533_p4) target bundleno = 18 (0x12), region = 32 }
   0xc   : > { %180 = sbr.rel (!%p31_p3) target bundleno = 18 (0x12), region = 36  ;;  %s182_s26 = sand.u32 (%p31_p3), 1, %s625_s19  }
   0xd   : > { %s535_s27 = sshll.u32 (%p31_p3), %s629_s20, 3  ;;  %s534_s28 = sshll.u32 (%p31_p3), %s182_s26, 4 }
   0xe   : > { %s186_s6 = scalar_lea.vmem (%p31_p3), %s774_s0, %s535_s27  ;;  %s184_s7 = scalar_lea.vmem (%p31_p3), [#allocation2], %s534_s28 }
   0xf   : > { %v217_v0 = vld [vmem:[%s186_s6] sm:$0xff] (%p31_p3)  ;;  %v219_v1 = vld [vmem:[%s186_s6 + $0x10] sm:$0xff] (%p31_p3) }
  0x10   : > { %218 = vst [vmem:[%s184_s7] sm:$0xff] (%p31_p3), %v217_v0 }
  0x11   : > { %220 = vst [vmem:[%s184_s7 + $0x8] sm:$0xff] %v219_v1 }
  0x12 PF: > { %p536_p5 = scmp.ge.s32.totalorder %s629_s20, 1  ;;  %p225_p6 = scmp.lt.s32.totalorder %s629_s20, 3 }
  0x14   : > { %p226_p7 = pnand %p536_p5, %p225_p6 }
  0x15   : > { %s232_s8 = sand.u32 (!%p226_p7), 1, %s621_s18   ;;  %s631_s11 = smov (!%p226_p7), 10  }
  0x16   : > { %229 = sbr.rel (%p226_p7) target bundleno = 557 (0x22d), region = 74  ;;  %s537_s9 = sshll.u32 (!%p226_p7), %s232_s8, 4 }
  0x17   : > { %s234_s10 = scalar_lea.vmem (!%p226_p7), [#allocation2], %s537_s9  ;;  %s632_s12 = smov (!%p226_p7), 1  }
  0x18   : > { %s633_s13 = smov (!%p226_p7), 11   ;;  %s635_s6 = smov (!%p226_p7), 127  }
  0x19   : > { %s636_s7 = smov (!%p226_p7), 119   ;;  %s637_s8 = smov (!%p226_p7), 117  }
  0x1a   : > { %s638_s9 = smov (!%p226_p7), 9   ;;  %p258_p8 = scmp.lt.s32.totalorder (!%p226_p7), %s530_s21, 1 }
  0x1b   : > { %v262_v2 = vld [vmem:[%s234_s10] sm:$0xff]  ;;  %v263_v3 = vld [vmem:[%s234_s10 + $0x8] sm:$0xff]  ;;  %vm274_vm0 = vcmask 130048   ;;  %v634_v7 = vmov 0   ;;  %s639_s10 = smov 118   ;;  %vm445_vm1 = vcmask 588800  }
  0x1c   : > { %v589_v4 = vpack.i.bf16 %v262_v2, %v263_v3  ;;  %324 = vmatpush.msra.mxu1 %v263_v3  ;;  %v265_v5 = vld [vmem:[%s776_s2] sm:$0xff]  ;;  %604 = vset.pattern.permute.xlu1 %v634_v7  ;;  %v539_v15 = vld [vmem:[%s776_s2 + $0x10] sm:$0xff]  ;;  %v546_v32 = vld [vmem:[%s776_s2 + $0x28] sm:$0xff]  ;;  %s784_s21 = smov (!%p258_p8, %s530_s21), 1 }
  0x1d   : > { %v409_v6 = vld [vmem:[%s777_s3] sm:$0xff]  ;;  %605 = vset.pattern.permute.xlu0 %v634_v7  ;;  %v549_v19 = vld [vmem:[%s776_s2 + $0x30] sm:$0xff]  ;;  %v550_v33 = vld [vmem:[%s776_s2 + $0x38] sm:$0xff]  ;;  %s538_s28 = sshll.u32 %s784_s21, 3 }
  0x1e   : > { %590 = vrot.lane.b32.xlu0 %v589_v4, %s631_s11  ;;  %600 = vrot.lane.b32.xlu1 %v589_v4, %s632_s12  ;;  %v545_v14 = vld [vmem:[%s776_s2 + $0x20] sm:$0xff]  ;;  %v540_v34 = vld [vmem:[%s776_s2 + $0x18] sm:$0xff] }
  0x1f   : > { %325 = vmatpush.msra.mxu1 %v262_v2  ;;  %v606_v28 = vld [vmem:[%s775_s1] ss:$0 sm:$0xff]  ;;  %v266_v35 = vld [vmem:[%s776_s2 + $0x8] sm:$0xff] }
  0x20   : > { %543 = vmatmul.msk.f32.vlgmr.msra.gmra.mxu1 %vm274_vm0, %v265_v5  ;;  %v410_v37 = vld [vmem:[%s777_s3 + $0x8] sm:$0xff]  ;;  %v444_v44 = vld [vmem:[%s778_s4] sm:$0xff] }
  0x26   : > { %595 = vrot.lane.b32.xlu0 %v589_v4, %s633_s13  ;;  %413 = vperm.xlu1 %604, %v409_v6  }
  0x28   : > { %544 = vmatmul.msk.f32.gmra.mxu1 %vm274_vm0, %v266_v35 }
  0x90   : > { %v591_v8 = vpop.permute.xlu0 %590  ;;  %v601_v9 = vpop.permute.xlu1 %600 }
  0x91   : > { %v592_v10 = vunpack.i.l.bf16 %v591_v8  ;;  %v602_v11 = vunpack.i.l.bf16 %v601_v9  ;;  %v603_v12 = vunpack.i.h.bf16 %v601_v9  ;;  %v593_v13 = vunpack.i.h.bf16 %v591_v8 }
  0x93   : > { %360 = vmatpush.msra.mxu2 %v592_v10  ;;  %295 = vmatpush.msra.mxu0 %v602_v11 }
  0x95   : > { %361 = vmatpush.msra.mxu2 %v593_v13  ;;  %296 = vmatpush.msra.mxu0 %v603_v12 }
  0x96   : > { %547 = vmatmul.msk.f32.vlgmr.msra.gmra.mxu2 %vm274_vm0, %v545_v14  ;;  %541 = vmatmul.msk.f32.vlgmr.msra.gmra.mxu0 %vm274_vm0, %v539_v15 }
  0x98   : > { %v596_v16 = vpop.permute.xlu0 %595  ;;  %v414_v26 = vpop.permute.xlu1 %413 }
  0x99   : > { %v597_v17 = vunpack.i.l.bf16 %v596_v16  ;;  %v598_v18 = vunpack.i.h.bf16 %v596_v16 }
  0x9b   : > { %398 = vmatpush.msra.mxu3 %v597_v17 }
  0x9d   : > { %399 = vmatpush.msra.mxu3 %v598_v18  ;;  %v327_v21 = vpop.f32.mrf.mxu1 }
  0x9e   : > { %551 = vmatmul.msk.f32.vlgmr.msra.gmra.mxu3 %vm274_vm0, %v549_v19  ;;  %548 = vmatmul.msk.f32.gmra.mxu2 %vm274_vm0, %v546_v32 }
  0x9f   : > { %542 = vmatmul.msk.f32.gmra.mxu0 %vm274_vm0, %v540_v34 }
  0xa5   : > { %v330_v47 = vpop.f32.mrf.mxu1 }
  0xa6   : > { %552 = vmatmul.msk.f32.gmra.mxu3 %vm274_vm0, %v550_v33 }
 0x113   : > { %v298_v20 = vpop.f32.mrf.mxu0 }
 0x114   : > { %v328_v22 = vadd.f32 %v327_v21, %v298_v20 }
 0x119   : > { %v363_v23 = vpop.f32.mrf.mxu2 }
 0x11a   : > { %v369_v24 = vadd.f32 %v363_v23, %v328_v22 }
 0x11c   : > { %v301_v46 = vpop.f32.mrf.mxu0 }
 0x11d   : > { %v331_v48 = vadd.f32 %v330_v47, %v301_v46 }
 0x121   : > { %v401_v25 = vpop.f32.mrf.mxu3  ;;  %v366_v49 = vpop.f32.mrf.mxu2 }
 0x122   : > { %v407_v27 = vadd.f32 %v401_v25, %v369_v24  ;;  %v370_v50 = vadd.f32 %v366_v49, %v331_v48 }
 0x124   : > { %v421_v29 = vadd.f32 %v414_v26, %v407_v27 }
 0x126   : > { %v423_v30 = vmax.f32 %v421_v29, 0.0 }
 0x128   : > { %v427_v31 = vmul.f32 %v606_v28, %v423_v30 }
 0x129   : > { %v404_v51 = vpop.f32.mrf.mxu3 }
 0x12a   : > { %436 = vrot.lane.b32.xlu1 %v427_v31, %s635_s6  ;;  %438 = vrot.lane.b32.xlu0 %v427_v31, %s636_s7  ;;  %v408_v52 = vadd.f32 %v404_v51, %v370_v50  ;;  %s261_s6 = scalar_lea.vmem %s779_s5, %s538_s28 }
 0x12b   : > { %442 = vrot.lane.b32.xlu2 %v427_v31, %s637_s8 }
 0x132   : > { %430 = vrot.lane.b32.xlu1 %v427_v31, %s631_s11  ;;  %432 = vrot.lane.b32.xlu0 %v427_v31, %s638_s9 }
 0x133   : > { %440 = vrot.lane.b32.xlu2 %v427_v31, %s639_s10 }
 0x13a   : > { %418 = vperm.xlu0 %605, %v410_v37  }
 0x13b   : > { %434 = vrot.lane.b32.xlu2 %v427_v31, %s632_s12 }
 0x143   : > { %428 = vrot.lane.b32.xlu2 %v427_v31, %s633_s13 }
 0x185   : > { %v443_v36 = vpop.permute.xlu2 %442 }
 0x186   : > { %456 = vmatpush.msrb.mxu0 %v443_v36 }
 0x18d   : > { %v441_v38 = vpop.permute.xlu2 %440 }
 0x18e   : > { %457 = vmatpush.msrb.mxu0 %v441_v38 }
 0x195   : > { %v435_v41 = vpop.permute.xlu2 %434 }
 0x19c   : > { %v437_v39 = vpop.permute.xlu1 %436  ;;  %v439_v40 = vpop.permute.xlu0 %438 }
 0x19d   : > { %458 = vmatpush.msrb.mxu0 %v439_v40  ;;  %v429_v45 = vpop.permute.xlu2 %428 }
 0x19f   : > { %459 = vmatpush.msrb.mxu0 %v437_v39 }
 0x1a1   : > { %460 = vmatpush.msrb.mxu0 %v427_v31 }
 0x1a3   : > { %461 = vmatpush.msrb.mxu0 %v435_v41 }
 0x1a4   : > { %v433_v42 = vpop.permute.xlu0 %432  ;;  %v431_v43 = vpop.permute.xlu1 %430 }
 0x1a5   : > { %462 = vmatpush.msrb.mxu0 %v433_v42 }
 0x1a7   : > { %463 = vmatpush.msrb.mxu0 %v431_v43 }
 0x1a9   : > { %464 = vmatpush.msrb.mxu0 %v429_v45 }
 0x1aa   : > { %553 = vmatmul.msk.f32.vlgmr.msrb.gmra.mxu0 %vm445_vm1, %v444_v44 }
 0x1ac   : > { %v419_v53 = vpop.permute.xlu0 %418 }
 0x1ad   : > { %v422_v54 = vadd.f32 %v419_v53, %v408_v52 }
 0x227   : > { %v466_v55 = vpop.f32.mrf.mxu0 }
 0x228   : > { %v467_v56 = vadd.f32 %v466_v55, %v422_v54 }
 0x22a   : > { %v469_v57 = vmax.f32 %v467_v56, 0.0 }
 0x22c   : > { %470 = vst [vmem:[%s261_s6] sm:$0xff] %v469_v57 }
 0x22d PF: > { %p12_p9 = scmp.ge.s32.totalorder %s687_s22, 4   ;;  %s780_s18 = smov %s625_s19 }
 0x22e   : > { %s781_s19 = smov %s696_s25  ;;  %s782_s20 = smov %s687_s22 }
 0x22f   :  { %14 = sbr.rel (!%p12_p9) target bundleno = 2 (0x2), region = 116 }

</bundles_post_ra>
